<compile_context>
chip_gen: v7x
topology: tpu7x:2x2x1
jax: 0.10.0
libtpu: 0.0.40
codegen_flags: <defaults>
</compile_context>

<pallas_src>
import jax
import jax.numpy as jnp
from jax.experimental import pallas as pl
from jax.experimental.pallas import tpu as pltpu


def _round_up(n, m):
    return ((n + m - 1) // m) * m


def _mean_kernel(x_ref, w_ref, b_ref, mean_ref):
    # mean = x @ W + b   (MXU matmul, f32 accumulate); output tile is
    # lane-dense (last dim is a multiple of 128) -> unmasked full-lane stores.
    acc = jnp.dot(x_ref[...], w_ref[...], preferred_element_type=jnp.float32)
    mean_ref[...] = (acc + b_ref[...]).astype(mean_ref.dtype)


@jax.jit
def diag_gaussian_forward(x, w, b, logstd):
    """Returns (action_mean (B, Dout), action_std (1, Dout))."""
    batch, num_inputs = x.shape
    num_outputs = w.shape[1]

    # Lane-dense output: pad the feature axis up to a multiple of 128.
    dout_p = _round_up(num_outputs, 128)
    w_p = jnp.pad(w, ((0, 0), (0, dout_p - num_outputs)))
    b_p = jnp.pad(b, ((0, 0), (0, dout_p - num_outputs)))

    # Batch tiling: cap tiles at 512 rows (fits v5e's 16 MiB scoped-VMEM
    # default with double buffering and headroom, and v7x's 64 MiB VMEM);
    # pad batch so the grid divides evenly (padded rows sliced off below).
    tm = min(512, _round_up(batch, 8))
    batch_p = _round_up(batch, tm)
    x_p = jnp.pad(x, ((0, batch_p - batch), (0, 0)))

    mean_p = pl.pallas_call(
        _mean_kernel,
        out_shape=jax.ShapeDtypeStruct((batch_p, dout_p), x.dtype),
        grid=(batch_p // tm,),
        in_specs=[
            pl.BlockSpec((tm, num_inputs), lambda i: (i, 0)),      # x tile
            pl.BlockSpec((num_inputs, dout_p), lambda i: (0, 0)),  # W resident
            pl.BlockSpec((1, dout_p), lambda i: (0, 0)),           # b resident
        ],
        out_specs=pl.BlockSpec((tm, dout_p), lambda i: (i, 0)),
        compiler_params=pltpu.CompilerParams(
            dimension_semantics=("parallel",),   # megacore on v7x
        ),
    )(x_p, w_p, b_p)

    mean = mean_p[:batch, :num_outputs]      # strip batch + lane padding
    std = jnp.exp(logstd)                    # (1, Dout), batch-invariant
    return mean, std


class FixedNormalJax:
    """JAX mirror of FixedNormal; std kept (1, Dout), broadcast lazily."""

    def __init__(self, mean, std):
        self.mean = mean   # (B, Dout)
        self.std = std     # (1, Dout)

    def mode(self):
        return self.mean

    def log_probs(self, actions):
        var = self.std ** 2
        lp = (-((actions - self.mean) ** 2) / (2.0 * var)
              - jnp.log(self.std) - 0.5 * jnp.log(2.0 * jnp.pi))
        return jnp.sum(lp, axis=-1, keepdims=True)

    def entropy(self):
        ent = jnp.sum(0.5 + 0.5 * jnp.log(2.0 * jnp.pi) + jnp.log(self.std),
                      axis=-1)
        return jnp.broadcast_to(ent, (self.mean.shape[0],))


def make_params(num_inputs, num_outputs, key):
    """Matches DiagGaussian.__init__: orthogonal W (gain=1), zero bias,
    zero logstd bias."""
    a = jax.random.normal(key, (num_inputs, num_outputs), dtype=jnp.float32)
    q, r = jnp.linalg.qr(a)
    q = q * jnp.sign(jnp.diag(r))[None, :]
    w = q.astype(jnp.float32)                          # (num_inputs, num_outputs)
    b = jnp.zeros((1, num_outputs), jnp.float32)       # linear bias
    logstd = jnp.zeros((1, num_outputs), jnp.float32)  # AddBias parameter
    return w, b, logstd


if __name__ == "__main__":
    key = jax.random.PRNGKey(0)
    k_x, k_w = jax.random.split(key)

    batch, num_inputs, num_outputs = 8, 32, 8
    x = jax.random.normal(k_x, (batch, num_inputs), dtype=jnp.float32)
    w, b, logstd = make_params(num_inputs, num_outputs, k_w)

    mean, std = diag_gaussian_forward(x, w, b, logstd)
    jax.block_until_ready((mean, std))

    dist = FixedNormalJax(mean, std)
    _ = jax.block_until_ready(dist.log_probs(dist.mode()))
    _ = jax.block_until_ready(dist.entropy())

    # sanity check against plain-JAX reference
    ref_mean = x @ w + b
    ref_std = jnp.exp(logstd)
    assert mean.shape == (batch, num_outputs)
    assert std.shape == (1, num_outputs)
    assert jnp.allclose(mean, ref_mean, atol=1e-5)
    assert jnp.allclose(std, ref_std, atol=1e-6)

    print("KERNEL_OK")
</pallas_src>

<mosaic_0001>
module attributes {stable_mosaic.version = 11 : i64} {
  func.func @_mean_kernel(%arg0: i32, %arg1: memref<8x32xf32, #tpu.memory_space<vmem>>, %arg2: memref<32x128xf32, #tpu.memory_space<vmem>>, %arg3: memref<1x128xf32, #tpu.memory_space<vmem>>, %arg4: memref<8x128xf32, #tpu.memory_space<vmem>>) attributes {dimension_semantics = [#tpu.dimension_semantics<parallel>], iteration_bounds = array<i64: 1>, scalar_prefetch = 0 : i64, scratch_operands = 0 : i64, tpu.core_type = #tpu.core_type<tc>, window_params = [{transform_indices = @transform_0, window_bounds = array<i64: 8, 32>}, {pipeline_mode = #tpu.pipeline_mode<synchronous>, transform_indices = @transform_1, window_bounds = array<i64: 32, 128>}, {pipeline_mode = #tpu.pipeline_mode<synchronous>, transform_indices = @transform_2, window_bounds = array<i64: 1, 128>}, {transform_indices = @transform_3, window_bounds = array<i64: 8, 128>}]} {
    %c0 = arith.constant 0 : index
    %c0_0 = arith.constant 0 : index
    %0 = vector.load %arg1[%c0, %c0_0] : memref<8x32xf32, #tpu.memory_space<vmem>>, vector<8x32xf32>
    %c0_1 = arith.constant 0 : index
    %c0_2 = arith.constant 0 : index
    %1 = vector.load %arg2[%c0_1, %c0_2] : memref<32x128xf32, #tpu.memory_space<vmem>>, vector<32x128xf32>
    %cst = arith.constant dense<0.000000e+00> : vector<8x128xf32>
    %2 = tpu.matmul %0, %1, %cst {dimension_numbers = #tpu.dot_dimension_numbers<[1], [0], [0], [1], [0, 0, 1, 1], [], []>} : vector<8x32xf32>, vector<32x128xf32>, vector<8x128xf32> -> vector<8x128xf32>
    %c0_3 = arith.constant 0 : index
    %c0_4 = arith.constant 0 : index
    %3 = vector.load %arg3[%c0_3, %c0_4] : memref<1x128xf32, #tpu.memory_space<vmem>>, vector<1x128xf32>
    %4 = vector.broadcast %3 : vector<1x128xf32> to vector<8x128xf32>
    %5 = arith.addf %2, %4 : vector<8x128xf32>
    %c0_5 = arith.constant 0 : index
    %c0_6 = arith.constant 0 : index
    %6 = vector.load %arg4[%c0_5, %c0_6] : memref<8x128xf32, #tpu.memory_space<vmem>>, vector<8x128xf32>
    tpu.vector_store %arg4[%c0_5, %c0_6], %5 {strides = array<i32>} : memref<8x128xf32, #tpu.memory_space<vmem>>, vector<8x128xf32>,
    return
  }
  func.func @transform_0(%arg0: i32) -> (i32, i32) {
    %c0_i32 = arith.constant 0 : i32
    %c0_i32_0 = arith.constant 0 : i32
    return %arg0, %c0_i32 : i32, i32
  }
  func.func @transform_1(%arg0: i32) -> (i32, i32) {
    %c0_i32 = arith.constant 0 : i32
    %c0_i32_0 = arith.constant 0 : i32
    %c0_i32_1 = arith.constant 0 : i32
    return %c0_i32, %c0_i32_0 : i32, i32
  }
  func.func @transform_2(%arg0: i32) -> (i32, i32) {
    %c0_i32 = arith.constant 0 : i32
    %c0_i32_0 = arith.constant 0 : i32
    %c0_i32_1 = arith.constant 0 : i32
    return %c0_i32, %c0_i32_0 : i32, i32
  }
  func.func @transform_3(%arg0: i32) -> (i32, i32) {
    %c0_i32 = arith.constant 0 : i32
    %c0_i32_0 = arith.constant 0 : i32
    return %arg0, %c0_i32 : i32, i32
  }
}

</mosaic_0001>

<bundles_post_ra>
// kernel: diag_gaussian_forward.1
= control target key start
LH: loop header
LB: loop body
LE: loop exit
PB: predicated region body
PF: predicated region fallthrough
CT: control target
= control target key end

     0   :  { %v168_v3 = vmov 0.0|0.0   ;;  %vm169_vm0 = vmmov 0   ;;  %v170_v6 = vmov 0.0   ;;  %s222_s0 = inlined_call_operand.vmem [shape: f32[8,32], index: 0, kind: input, shape index: {}]   ;;  %s223_s1 = inlined_call_operand.vmem [shape: f32[32,128], index: 1, kind: input, shape index: {}]   ;;  %s224_s2 = inlined_call_operand.vmem [shape: f32[1,128], index: 2, kind: input, shape index: {}]   ;;  %s225_s3 = inlined_call_operand.hbm [shape: f32[8,128], index: 3, kind: output, shape index: {}]  }
   0x1   :  { %v16_v0 = vld [vmem:[%s223_s1] sm:$0xff]  ;;  %v17_v1 = vld [vmem:[%s223_s1 + $0x8] sm:$0xff]  ;;  %v18_v2 = vld [vmem:[%s223_s1 + $0x10] sm:$0xff]  ;;  %134 = vmatprep.subr.bf16.mxu0 %v168_v3  ;;  %131 = vmatprep.mubr.msk.f32.mxu0 %vm169_vm0, %v170_v6 }
   0x2   :  { %v135_v4 = vpack.c.bf16 %v17_v1, %v16_v0  ;;  %v19_v5 = vld [vmem:[%s223_s1 + $0x18] sm:$0xff] }
   0x3   :  { %8 = vsyncpa [#allocation3], 0  ;;  %v138_v7 = vpack.c.bf16 %v19_v5, %v18_v2  ;;  %v15_v8 = vld [vmem:[%s222_s0] sm:$0xff]  ;;  %vm27_vm1 = vcmask 261120   ;;  %s171_s24 = smov [#allocation2]  }
   0x4   :  { %136 = vmatpush3.bf16.msra.mxu0 %v135_v4  ;;  %v116_v9 = vld [vmem:[%s224_s2] ss:$0 sm:$0xff]  ;;  %s108_s1 = sshll.u32 %s171_s24, 4  ;;  %s109_s1 = int_to_ptr.vmem [resolvable:$true] %s108_s1 }
   0x5   :  { %137 = vmatprep.subr.bf16.mxu0 %v168_v3  ;;  %s144_s25 = scalar_lea.vmem %s109_s1, 128  ;;  %p149_p1 = scmp.lt.s32.totalorder %s109_s1, %s109_s1 }
   0x6   :  { %p145_p0 = scmp.ne.s32.totalorder %s109_s1, %s144_s25  ;;  %p150_p2 = scmp.lt.s32.totalorder %s144_s25, %s144_s25 }
   0x8   :  { %139 = vmatpush3.bf16.msra.mxu0 %v138_v7  ;;  %p151_p3 = por %p150_p2, %p149_p1 }
   0xa   :  { %p152_p4 = pnand %p151_p3, %p145_p0 }
   0xb   :  { %132 = vmatmul.mubr.msk.f32.vlgmr.msra.gmra.mrb[0].mxu0 %vm27_vm1, %v15_v8 }
  0xde   :  { %v97_v10 = vpop.f32.mrb[0].mxu0 }
  0xdf   :  { %v98_v11 = vadd.f32 %v116_v9, %v97_v10  ;;  %v133_v12 = vpop.f32.mrb[1].mxu0 }
  0xe1   :  { %101 = vst [vmem:[#allocation2] sm:$0xff] %v98_v11 }
  0xe2   :  { %155 = shalt.err (!%p152_p4)
}
  0xe3   :  { %s156_s27 = scalar_lea.hbm %s225_s3, 128 }
  0xe4   :  { %p157_p5 = scmp.ne.s32.totalorder %s225_s3, %s156_s27  ;;  %p160_p6 = scmp.lt.u32.totalorder %s156_s27, %s225_s3 }
  0xe6   :  { %p162_p7 = pnand %p160_p6, %p157_p5 }
  0xe8   :  { %165 = shalt.err (!%p162_p7)
}
  0xe9   :  { %111 = dma.vmem_to_hbm [thread:$0]  %s109_s1, 128, %s225_s3, [#allocation3]  }
  0xea   :  { %166 = dma.done.wait [#allocation3], 128  }
  0xeb   :  { %167 = vsyncadd [#allocation3], 4294967168 }
  0xec   :  { %115 = vsyncpa [#allocation3], 1 }

</bundles_post_ra>
